<compile_context>
chip_gen: v5e
topology: v5e:2x2
jax: 0.10.0
libtpu: 0.0.40
codegen_flags: <defaults>
</compile_context>

<pallas_src>
import functools

import jax
import jax.numpy as jnp
from jax import lax
from jax.experimental import pallas as pl
from jax.experimental.pallas import tpu as pltpu


def _contrastive_loss_kernel(inv_temp_ref, img_ref, txt_ref,
                             loss_i_ref, loss_t_ref,
                             txt_n_ref, m_t_ref, l_t_ref,
                             *, tile_m):
    i = pl.program_id(0)
    n_tiles = pl.num_programs(0)
    B = txt_ref.shape[0]

    inv_temp = inv_temp_ref[0]            # precomputed 1/temperature (SMEM scalar)

    @pl.when(i == 0)
    def _init():
        # Normalize the text embeddings once; kept resident in VMEM scratch.
        txt = txt_ref[...].astype(jnp.float32)
        txt_n_ref[...] = txt * lax.rsqrt(
            jnp.sum(txt * txt, axis=-1, keepdims=True))
        m_t_ref[...] = jnp.full(m_t_ref.shape, -jnp.inf, dtype=jnp.float32)
        l_t_ref[...] = jnp.zeros(l_t_ref.shape, dtype=jnp.float32)
        loss_i_ref[...] = jnp.zeros_like(loss_i_ref)   # accumulates sum(lse_i - diag)
        loss_t_ref[...] = jnp.zeros_like(loss_t_ref)   # accumulates -sum(diag)

    # --- normalize this image tile, folding in 1/temperature (rsqrt on EUP) ---
    img = img_ref[...].astype(jnp.float32)                               # (TM, D)
    img_s = img * (lax.rsqrt(jnp.sum(img * img, axis=-1, keepdims=True)) * inv_temp)

    txt_n = txt_n_ref[...]                                               # (B, D)

    # Logits tile: contract over the embedding dim without materializing txt.T.
    s = lax.dot_general(img_s, txt_n,
                        dimension_numbers=(((1,), (1,)), ((), ())),
                        preferred_element_type=jnp.float32)              # (TM, B)

    # Correct-class logits for this row tile, straight from the embeddings
    # (already includes 1/temperature through img_s).
    row_start = pl.multiple_of(i * tile_m, tile_m)
    txt_rows = txt_n_ref[pl.ds(row_start, tile_m), :]                    # (TM, D)
    diag = jnp.sum(img_s * txt_rows, axis=-1, keepdims=True)             # (TM, 1)

    # --- image -> text loss: full rows available, stable softmax CE -----------
    m_i = jnp.max(s, axis=-1, keepdims=True)                             # (TM, 1)
    lse_i = m_i + jnp.log(jnp.sum(jnp.exp(s - m_i), axis=-1, keepdims=True))
    loss_i_ref[...] += jnp.sum(lse_i - diag, axis=0, keepdims=True)      # (1, 1)
    loss_t_ref[...] -= jnp.sum(diag, axis=0, keepdims=True)              # (1, 1)

    # --- text -> image loss: online softmax over columns (no transpose) -------
    m_old = m_t_ref[...]                                                 # (1, B)
    m_new = jnp.maximum(m_old, jnp.max(s, axis=0, keepdims=True))        # (1, B)
    l_t_ref[...] = (l_t_ref[...] * jnp.exp(m_old - m_new)
                    + jnp.sum(jnp.exp(s - m_new), axis=0, keepdims=True))
    m_t_ref[...] = m_new

    @pl.when(i == n_tiles - 1)
    def _finalize():
        lse_t = m_t_ref[...] + jnp.log(l_t_ref[...])                     # (1, B)
        inv_b = jnp.float32(1.0 / B)
        loss_i_ref[...] = loss_i_ref[...] * inv_b
        # sum_j diag_t[j] == sum_i diag[i], already folded into loss_t_ref.
        loss_t_ref[...] = (loss_t_ref[...]
                           + jnp.sum(lse_t, axis=-1, keepdims=True)) * inv_b


def _pick_row_tile(batch):
    """Row-tile size: full batch when small, else a multiple of 8 that divides B."""
    if batch <= 256:
        return batch
    for tm in (512, 256, 128, 64, 32, 16, 8):
        if batch % tm == 0:
            return tm
    return batch  # fallback: single monolithic block


def contrastive_loss_with_temperature(image_embeds, text_embeds, temperature,
                                      tile_m=None):
    """Pallas wrapper: returns (loss_i, loss_t) as f32 scalars."""
    B, D = image_embeds.shape
    assert text_embeds.shape == (B, D)
    if tile_m is None:
        tile_m = _pick_row_tile(B)
    assert B % tile_m == 0, "row tile must divide the batch"
    n_tiles = B // tile_m

    # One scalar divide on the host/XLA side -- avoids any in-kernel f32 scalar divide.
    inv_temp = (1.0 / jnp.asarray(temperature, dtype=jnp.float32)).reshape((1,))
    kernel = functools.partial(_contrastive_loss_kernel, tile_m=tile_m)

    itemsize = jnp.dtype(image_embeds.dtype).itemsize
    cost = pl.CostEstimate(
        flops=2 * B * B * D + 6 * B * D,
        transcendentals=2 * B * B + 2 * B,
        bytes_accessed=2 * B * D * itemsize + 8,
    )

    loss_i, loss_t = pl.pallas_call(
        kernel,
        grid=(n_tiles,),
        out_shape=(
            jax.ShapeDtypeStruct((1, 1), jnp.float32),
            jax.ShapeDtypeStruct((1, 1), jnp.float32),
        ),
        in_specs=[
            pl.BlockSpec(memory_space=pltpu.MemorySpace.SMEM),  # 1/temperature scalar
            pl.BlockSpec((tile_m, D), lambda i: (i, 0)),        # image row tile
            pl.BlockSpec((B, D), lambda i: (0, 0)),             # full text embeds (resident)
        ],
        out_specs=(
            pl.BlockSpec((1, 1), lambda i: (0, 0)),             # loss_i accumulator
            pl.BlockSpec((1, 1), lambda i: (0, 0)),             # loss_t accumulator
        ),
        scratch_shapes=[
            pltpu.VMEM((B, D), jnp.float32),   # normalized text embeddings
            pltpu.VMEM((1, B), jnp.float32),   # running column max
            pltpu.VMEM((1, B), jnp.float32),   # running column sum of exp
        ],
        compiler_params=pltpu.CompilerParams(
            dimension_semantics=("arbitrary",),   # column-softmax state carried across tiles
        ),
        cost_estimate=cost,
    )(inv_temp, image_embeds, text_embeds)
    return loss_i[0, 0], loss_t[0, 0]


def _reference(image_embeds, text_embeds, temperature):
    """Pure-JAX reference mirroring the PyTorch forward."""
    img = image_embeds / jnp.linalg.norm(image_embeds, axis=-1, keepdims=True)
    txt = text_embeds / jnp.linalg.norm(text_embeds, axis=-1, keepdims=True)
    logits_i = (img @ txt.T) / temperature
    logits_t = logits_i.T
    labels = jnp.arange(img.shape[0])

    def ce(logits, labels):
        lse = jax.scipy.special.logsumexp(logits, axis=-1)
        correct = logits[jnp.arange(logits.shape[0]), labels]
        return jnp.mean(lse - correct)

    return ce(logits_i, labels), ce(logits_t, labels)


if __name__ == "__main__":
    # Deterministic parameter init: temperature = 1.0 (module default __init__ value).
    initial_temperature = 1.0
    key = jax.random.PRNGKey(0)
    k_img, k_txt = jax.random.split(key)

    # Test 1: small shapes, single row tile.
    B, D = 8, 32
    image_embeds = jax.random.normal(k_img, (B, D), dtype=jnp.float32)
    text_embeds = jax.random.normal(k_txt, (B, D), dtype=jnp.float32)

    loss_i, loss_t = contrastive_loss_with_temperature(
        image_embeds, text_embeds, initial_temperature)
    loss_i, loss_t = jax.block_until_ready((loss_i, loss_t))

    ref_i, ref_t = _reference(image_embeds, text_embeds, initial_temperature)
    assert jnp.allclose(loss_i, ref_i, atol=1e-5, rtol=1e-4), (loss_i, ref_i)
    assert jnp.allclose(loss_t, ref_t, atol=1e-5, rtol=1e-4), (loss_t, ref_t)

    # Test 2: exercise the multi-tile grid path (2 row tiles, online column softmax).
    B2, D2 = 16, 32
    k_img2, k_txt2 = jax.random.split(jax.random.PRNGKey(1))
    img2 = jax.random.normal(k_img2, (B2, D2), dtype=jnp.float32)
    txt2 = jax.random.normal(k_txt2, (B2, D2), dtype=jnp.float32)
    li2, lt2 = contrastive_loss_with_temperature(img2, txt2, 0.5, tile_m=8)
    li2, lt2 = jax.block_until_ready((li2, lt2))
    ri2, rt2 = _reference(img2, txt2, 0.5)
    assert jnp.allclose(li2, ri2, atol=1e-5, rtol=1e-4), (li2, ri2)
    assert jnp.allclose(lt2, rt2, atol=1e-5, rtol=1e-4), (lt2, rt2)

    print("KERNEL_OK")
</pallas_src>

<mosaic_0001>
module attributes {stable_mosaic.version = 11 : i64} {
  func.func @_contrastive_loss_kernel(%arg0: i32, %arg1: memref<1xf32, #tpu.memory_space<smem>>, %arg2: memref<8x32xf32, #tpu.memory_space<vmem>>, %arg3: memref<8x32xf32, #tpu.memory_space<vmem>>, %arg4: memref<1x1xf32, #tpu.memory_space<vmem>>, %arg5: memref<1x1xf32, #tpu.memory_space<vmem>>, %arg6: memref<8x32xf32, #tpu.memory_space<vmem>>, %arg7: memref<1x8xf32, #tpu.memory_space<vmem>>, %arg8: memref<1x8xf32, #tpu.memory_space<vmem>>) attributes {dimension_semantics = [#tpu.dimension_semantics<arbitrary>], iteration_bounds = array<i64: 1>, scalar_prefetch = 0 : i64, scratch_operands = 3 : i64, tpu.core_type = #tpu.core_type<tc>, window_params = [{transform_indices = @transform_0, window_bounds = array<i64: 1>}, {transform_indices = @transform_1, window_bounds = array<i64: 8, 32>}, {pipeline_mode = #tpu.pipeline_mode<synchronous>, transform_indices = @transform_2, window_bounds = array<i64: 8, 32>}, {pipeline_mode = #tpu.pipeline_mode<synchronous>, transform_indices = @transform_3, window_bounds = array<i64: 1, 1>}, {pipeline_mode = #tpu.pipeline_mode<synchronous>, transform_indices = @transform_4, window_bounds = array<i64: 1, 1>}]} {
    %c0 = arith.constant 0 : index
    %0 = memref.load %arg1[%c0] : memref<1xf32, #tpu.memory_space<smem>>
    %c0_i32 = arith.constant 0 : i32
    %1 = arith.cmpi eq, %arg0, %c0_i32 : i32
    %2 = arith.extui %1 : i1 to i32
    %c0_i32_0 = arith.constant 0 : i32
    %3 = arith.cmpi ne, %2, %c0_i32_0 : i32
    scf.if %3 {
      %c0_32 = arith.constant 0 : index
      %c0_33 = arith.constant 0 : index
      %61 = vector.load %arg3[%c0_32, %c0_33] : memref<8x32xf32, #tpu.memory_space<vmem>>, vector<8x32xf32>
      %62 = arith.mulf %61, %61 : vector<8x32xf32>
      %cst_34 = arith.constant dense<0.000000e+00> : vector<8xf32>
      %63 = vector.multi_reduction <add>, %62, %cst_34 [1] : vector<8x32xf32> to vector<8xf32>
      %64 = vector.shape_cast %63 : vector<8xf32> to vector<8x1xf32>
      %65 = math.rsqrt %64 : vector<8x1xf32>
      %66 = vector.broadcast %65 : vector<8x1xf32> to vector<8x32xf32>
      %67 = arith.mulf %61, %66 : vector<8x32xf32>
      %c0_35 = arith.constant 0 : index
      %c0_36 = arith.constant 0 : index
      %68 = vector.load %arg6[%c0_35, %c0_36] : memref<8x32xf32, #tpu.memory_space<vmem>>, vector<8x32xf32>
      tpu.vector_store %arg6[%c0_35, %c0_36], %67 {strides = array<i32>} : memref<8x32xf32, #tpu.memory_space<vmem>>, vector<8x32xf32>,
      %cst_37 = arith.constant 0xFF800000 : f32
      %69 = vector.broadcast %cst_37 : f32 to vector<1x8xf32>
      %c0_38 = arith.constant 0 : index
      %c0_39 = arith.constant 0 : index
      %70 = vector.load %arg7[%c0_38, %c0_39] : memref<1x8xf32, #tpu.memory_space<vmem>>, vector<1x8xf32>
      tpu.vector_store %arg7[%c0_38, %c0_39], %69 {strides = array<i32>} : memref<1x8xf32, #tpu.memory_space<vmem>>, vector<1x8xf32>,
      %cst_40 = arith.constant 0.000000e+00 : f32
      %71 = vector.broadcast %cst_40 : f32 to vector<1x8xf32>
      %c0_41 = arith.constant 0 : index
      %c0_42 = arith.constant 0 : index
      %72 = vector.load %arg8[%c0_41, %c0_42] : memref<1x8xf32, #tpu.memory_space<vmem>>, vector<1x8xf32>
      tpu.vector_store %arg8[%c0_41, %c0_42], %71 {strides = array<i32>} : memref<1x8xf32, #tpu.memory_space<vmem>>, vector<1x8xf32>,
      %cst_43 = arith.constant 0.000000e+00 : f32
      %73 = vector.broadcast %cst_43 : f32 to vector<1x1xf32>
      %c0_44 = arith.constant 0 : index
      %c0_45 = arith.constant 0 : index
      %74 = vector.load %arg4[%c0_44, %c0_45] : memref<1x1xf32, #tpu.memory_space<vmem>>, vector<1x1xf32>
      tpu.vector_store %arg4[%c0_44, %c0_45], %73 {strides = array<i32>} : memref<1x1xf32, #tpu.memory_space<vmem>>, vector<1x1xf32>,
      %cst_46 = arith.constant 0.000000e+00 : f32
      %75 = vector.broadcast %cst_46 : f32 to vector<1x1xf32>
      %c0_47 = arith.constant 0 : index
      %c0_48 = arith.constant 0 : index
      %76 = vector.load %arg5[%c0_47, %c0_48] : memref<1x1xf32, #tpu.memory_space<vmem>>, vector<1x1xf32>
      tpu.vector_store %arg5[%c0_47, %c0_48], %75 {strides = array<i32>} : memref<1x1xf32, #tpu.memory_space<vmem>>, vector<1x1xf32>,
    } else {
    }
    %c0_1 = arith.constant 0 : index
    %c0_2 = arith.constant 0 : index
    %4 = vector.load %arg2[%c0_1, %c0_2] : memref<8x32xf32, #tpu.memory_space<vmem>>, vector<8x32xf32>
    %5 = arith.mulf %4, %4 : vector<8x32xf32>
    %cst = arith.constant dense<0.000000e+00> : vector<8xf32>
    %6 = vector.multi_reduction <add>, %5, %cst [1] : vector<8x32xf32> to vector<8xf32>
    %7 = vector.shape_cast %6 : vector<8xf32> to vector<8x1xf32>
    %8 = math.rsqrt %7 : vector<8x1xf32>
    %9 = vector.broadcast %0 : f32 to vector<8x1xf32>
    %10 = arith.mulf %8, %9 : vector<8x1xf32>
    %11 = vector.broadcast %10 : vector<8x1xf32> to vector<8x32xf32>
    %12 = arith.mulf %4, %11 : vector<8x32xf32>
    %c0_3 = arith.constant 0 : index
    %c0_4 = arith.constant 0 : index
    %13 = vector.load %arg6[%c0_3, %c0_4] : memref<8x32xf32, #tpu.memory_space<vmem>>, vector<8x32xf32>
    %cst_5 = arith.constant dense<0.000000e+00> : vector<8x8xf32>
    %14 = tpu.matmul %12, %13, %cst_5 {dimension_numbers = #tpu.dot_dimension_numbers<[1], [1], [0], [0], [0, 0, 1, 0], [], []>} : vector<8x32xf32>, vector<8x32xf32>, vector<8x8xf32> -> vector<8x8xf32>
    %c8_i32 = arith.constant 8 : i32
    %15 = arith.muli %arg0, %c8_i32 : i32
    %16 = tpu.assume_multiple %15, 8 : i32
    %17 = arith.index_cast %16 : i32 to index
    %c0_6 = arith.constant 0 : index
    %18 = vector.load %arg6[%17, %c0_6] : memref<8x32xf32, #tpu.memory_space<vmem>>, vector<8x32xf32>
    %19 = arith.mulf %12, %18 : vector<8x32xf32>
    %cst_7 = arith.constant dense<0.000000e+00> : vector<8xf32>
    %20 = vector.multi_reduction <add>, %19, %cst_7 [1] : vector<8x32xf32> to vector<8xf32>
    %21 = vector.shape_cast %20 : vector<8xf32> to vector<8x1xf32>
    %cst_8 = arith.constant dense<0xFF800000> : vector<8xf32>
    %22 = vector.multi_reduction <maximumf>, %14, %cst_8 [1] : vector<8x8xf32> to vector<8xf32>
    %23 = vector.shape_cast %22 : vector<8xf32> to vector<8x1xf32>
    %24 = vector.broadcast %23 : vector<8x1xf32> to vector<8x8xf32>
    %25 = arith.subf %14, %24 : vector<8x8xf32>
    %26 = math.exp %25 : vector<8x8xf32>
    %cst_9 = arith.constant dense<0.000000e+00> : vector<8xf32>
    %27 = vector.multi_reduction <add>, %26, %cst_9 [1] : vector<8x8xf32> to vector<8xf32>
    %28 = vector.shape_cast %27 : vector<8xf32> to vector<8x1xf32>
    %29 = math.log %28 : vector<8x1xf32>
    %30 = arith.addf %23, %29 : vector<8x1xf32>
    %c0_10 = arith.constant 0 : index
    %c0_11 = arith.constant 0 : index
    %31 = vector.load %arg4[%c0_10, %c0_11] : memref<1x1xf32, #tpu.memory_space<vmem>>, vector<1x1xf32>
    %32 = arith.subf %30, %21 : vector<8x1xf32>
    %cst_12 = arith.constant dense<0.000000e+00> : vector<1xf32>
    %33 = vector.multi_reduction <add>, %32, %cst_12 [0] : vector<8x1xf32> to vector<1xf32>
    %34 = vector.shape_cast %33 : vector<1xf32> to vector<1x1xf32>
    %35 = arith.addf %31, %34 : vector<1x1xf32>
    %c0_13 = arith.constant 0 : index
    %c0_14 = arith.constant 0 : index
    %36 = vector.load %arg4[%c0_13, %c0_14] : memref<1x1xf32, #tpu.memory_space<vmem>>, vector<1x1xf32>
    tpu.vector_store %arg4[%c0_13, %c0_14], %35 {strides = array<i32>} : memref<1x1xf32, #tpu.memory_space<vmem>>, vector<1x1xf32>,
    %c0_15 = arith.constant 0 : index
    %c0_16 = arith.constant 0 : index
    %37 = vector.load %arg5[%c0_15, %c0_16] : memref<1x1xf32, #tpu.memory_space<vmem>>, vector<1x1xf32>
    %cst_17 = arith.constant dense<0.000000e+00> : vector<1xf32>
    %38 = vector.multi_reduction <add>, %21, %cst_17 [0] : vector<8x1xf32> to vector<1xf32>
    %39 = vector.shape_cast %38 : vector<1xf32> to vector<1x1xf32>
    %40 = arith.subf %37, %39 : vector<1x1xf32>
    %c0_18 = arith.constant 0 : index
    %c0_19 = arith.constant 0 : index
    %41 = vector.load %arg5[%c0_18, %c0_19] : memref<1x1xf32, #tpu.memory_space<vmem>>, vector<1x1xf32>
    tpu.vector_store %arg5[%c0_18, %c0_19], %40 {strides = array<i32>} : memref<1x1xf32, #tpu.memory_space<vmem>>, vector<1x1xf32>,
    %c0_20 = arith.constant 0 : index
    %c0_21 = arith.constant 0 : index
    %42 = vector.load %arg7[%c0_20, %c0_21] : memref<1x8xf32, #tpu.memory_space<vmem>>, vector<1x8xf32>
    %cst_22 = arith.constant dense<0xFF800000> : vector<8xf32>
    %43 = vector.multi_reduction <maximumf>, %14, %cst_22 [0] : vector<8x8xf32> to vector<8xf32>
    %44 = vector.shape_cast %43 : vector<8xf32> to vector<1x8xf32>
    %45 = arith.maximumf %42, %44 : vector<1x8xf32>
    %c0_23 = arith.constant 0 : index
    %c0_24 = arith.constant 0 : index
    %46 = vector.load %arg8[%c0_23, %c0_24] : memref<1x8xf32, #tpu.memory_space<vmem>>, vector<1x8xf32>
    %47 = arith.subf %42, %45 : vector<1x8xf32>
    %48 = math.exp %47 : vector<1x8xf32>
    %49 = arith.mulf %46, %48 : vector<1x8xf32>
    %50 = vector.broadcast %45 : vector<1x8xf32> to vector<8x8xf32>
    %51 = arith.subf %14, %50 : vector<8x8xf32>
    %52 = math.exp %51 : vector<8x8xf32>
    %cst_25 = arith.constant dense<0.000000e+00> : vector<8xf32>
    %53 = vector.multi_reduction <add>, %52, %cst_25 [0] : vector<8x8xf32> to vector<8xf32>
    %54 = vector.shape_cast %53 : vector<8xf32> to vector<1x8xf32>
    %55 = arith.addf %49, %54 : vector<1x8xf32>
    %c0_26 = arith.constant 0 : index
    %c0_27 = arith.constant 0 : index
    %56 = vector.load %arg8[%c0_26, %c0_27] : memref<1x8xf32, #tpu.memory_space<vmem>>, vector<1x8xf32>
    tpu.vector_store %arg8[%c0_26, %c0_27], %55 {strides = array<i32>} : memref<1x8xf32, #tpu.memory_space<vmem>>, vector<1x8xf32>,
    %c0_28 = arith.constant 0 : index
    %c0_29 = arith.constant 0 : index
    %57 = vector.load %arg7[%c0_28, %c0_29] : memref<1x8xf32, #tpu.memory_space<vmem>>, vector<1x8xf32>
    tpu.vector_store %arg7[%c0_28, %c0_29], %45 {strides = array<i32>} : memref<1x8xf32, #tpu.memory_space<vmem>>, vector<1x8xf32>,
    %c0_i32_30 = arith.constant 0 : i32
    %58 = arith.cmpi eq, %arg0, %c0_i32_30 : i32
    %59 = arith.extui %58 : i1 to i32
    %c0_i32_31 = arith.constant 0 : i32
    %60 = arith.cmpi ne, %59, %c0_i32_31 : i32
    scf.if %60 {
      %c0_32 = arith.constant 0 : index
      %c0_33 = arith.constant 0 : index
      %61 = vector.load %arg7[%c0_32, %c0_33] : memref<1x8xf32, #tpu.memory_space<vmem>>, vector<1x8xf32>
      %c0_34 = arith.constant 0 : index
      %c0_35 = arith.constant 0 : index
      %62 = vector.load %arg8[%c0_34, %c0_35] : memref<1x8xf32, #tpu.memory_space<vmem>>, vector<1x8xf32>
      %63 = math.log %62 : vector<1x8xf32>
      %64 = arith.addf %61, %63 : vector<1x8xf32>
      %c0_36 = arith.constant 0 : index
      %c0_37 = arith.constant 0 : index
      %65 = vector.load %arg4[%c0_36, %c0_37] : memref<1x1xf32, #tpu.memory_space<vmem>>, vector<1x1xf32>
      %cst_38 = arith.constant 1.250000e-01 : f32
      %66 = vector.broadcast %cst_38 : f32 to vector<1x1xf32>
      %67 = arith.mulf %65, %66 : vector<1x1xf32>
      %c0_39 = arith.constant 0 : index
      %c0_40 = arith.constant 0 : index
      %68 = vector.load %arg4[%c0_39, %c0_40] : memref<1x1xf32, #tpu.memory_space<vmem>>, vector<1x1xf32>
      tpu.vector_store %arg4[%c0_39, %c0_40], %67 {strides = array<i32>} : memref<1x1xf32, #tpu.memory_space<vmem>>, vector<1x1xf32>,
      %c0_41 = arith.constant 0 : index
      %c0_42 = arith.constant 0 : index
      %69 = vector.load %arg5[%c0_41, %c0_42] : memref<1x1xf32, #tpu.memory_space<vmem>>, vector<1x1xf32>
      %cst_43 = arith.constant dense<0.000000e+00> : vector<1xf32>
      %70 = vector.multi_reduction <add>, %64, %cst_43 [1] : vector<1x8xf32> to vector<1xf32>
      %71 = vector.shape_cast %70 : vector<1xf32> to vector<1x1xf32>
      %72 = arith.addf %69, %71 : vector<1x1xf32>
      %cst_44 = arith.constant 1.250000e-01 : f32
      %73 = vector.broadcast %cst_44 : f32 to vector<1x1xf32>
      %74 = arith.mulf %72, %73 : vector<1x1xf32>
      %c0_45 = arith.constant 0 : index
      %c0_46 = arith.constant 0 : index
      %75 = vector.load %arg5[%c0_45, %c0_46] : memref<1x1xf32, #tpu.memory_space<vmem>>, vector<1x1xf32>
      tpu.vector_store %arg5[%c0_45, %c0_46], %74 {strides = array<i32>} : memref<1x1xf32, #tpu.memory_space<vmem>>, vector<1x1xf32>,
    } else {
    }
    return
  }
  func.func @transform_0(%arg0: i32) -> i32 {
    %c0_i32 = arith.constant 0 : i32
    %c0_i32_0 = arith.constant 0 : i32
    return %c0_i32 : i32
  }
  func.func @transform_1(%arg0: i32) -> (i32, i32) {
    %c0_i32 = arith.constant 0 : i32
    %c0_i32_0 = arith.constant 0 : i32
    return %arg0, %c0_i32 : i32, i32
  }
  func.func @transform_2(%arg0: i32) -> (i32, i32) {
    %c0_i32 = arith.constant 0 : i32
    %c0_i32_0 = arith.constant 0 : i32
    %c0_i32_1 = arith.constant 0 : i32
    return %c0_i32, %c0_i32_0 : i32, i32
  }
  func.func @transform_3(%arg0: i32) -> (i32, i32) {
    %c0_i32 = arith.constant 0 : i32
    %c0_i32_0 = arith.constant 0 : i32
    %c0_i32_1 = arith.constant 0 : i32
    return %c0_i32, %c0_i32_0 : i32, i32
  }
  func.func @transform_4(%arg0: i32) -> (i32, i32) {
    %c0_i32 = arith.constant 0 : i32
    %c0_i32_0 = arith.constant 0 : i32
    %c0_i32_1 = arith.constant 0 : i32
    return %c0_i32, %c0_i32_0 : i32, i32
  }
}

</mosaic_0001>

<bundles_post_ra>
// kernel: tpu_custom_call.1
= control target key start
LH: loop header
LB: loop body
LE: loop exit
PB: predicated region body
PF: predicated region fallthrough
CT: control target
= control target key end

     0   :  { %11 = vsyncpa [#allocation7], 0  ;;  %s441_s0 = inlined_call_operand.<no memory space> [shape: f32[1], index: 0, kind: input, shape index: {}]   ;;  %s442_s1 = inlined_call_operand.hbm [shape: f32[8,32], index: 1, kind: input, shape index: {}]   ;;  %s443_s2 = inlined_call_operand.hbm [shape: f32[8,32], index: 2, kind: input, shape index: {}]   ;;  %s444_s3 = inlined_call_operand.hbm [shape: f32[1,1], index: 3, kind: output, shape index: {0}]   ;;  %s445_s4 = inlined_call_operand.hbm [shape: f32[1,1], index: 4, kind: output, shape index: {1}]  }
   0x1   :  { %12 = vsyncpa [#allocation10], 0 }
   0x2   :  { %13 = vsyncpa [#allocation8], 0 }
   0x3   :  { %14 = vsyncpa [#allocation13], 0  ;;  %s22_s17 = sshll.u32 %s442_s1, 4  ;;  %s370_s18 = smov [#allocation6]   ;;  %s23_s17 = int_to_ptr.hbm [resolvable:$true] %s22_s17 }
   0x4   :  { %s24_s19 = sshll.u32 %s370_s18, 4  ;;  %s33_s22 = sshll.u32 %s443_s2, 4  ;;  %s25_s19 = int_to_ptr.vmem [resolvable:$true] %s24_s19  ;;  %s34_s22 = int_to_ptr.hbm [resolvable:$true] %s33_s22 }
   0x5   :  { %27 = dma.hbm_to_vmem [thread:$0]  %s23_s17, 128, %s25_s19, [#allocation7]  }
   0x6   :  { %s371_s23 = smov [#allocation9]  }
   0x7   :  { %s35_s24 = sshll.u32 %s371_s23, 4  ;;  %s36_s24 = int_to_ptr.vmem [resolvable:$true] %s35_s24 }
   0x8   :  { %38 = dma.hbm_to_vmem [thread:$0]  %s34_s22, 128, %s36_s24, [#allocation10]  }
   0x9   :  { %362 = dma.done.wait [#allocation7], 128  }
   0xa   :  { %363 = vsyncadd [#allocation7], 4294967168 }
   0xb   :  { %364 = dma.done.wait [#allocation10], 128  }
   0xc   :  { %365 = vsyncadd [#allocation10], 4294967168  ;;  %v52_v0 = vld [vmem:[#allocation9] sm:$0xff]  ;;  %vm54_vm0 = vcmask 261120   ;;  %v76_v2 = vld [vmem:[#allocation6] sm:$0xff]  ;;  %vm73_vm1 = vcmask 0   ;;  %v92_v23 = vstv %s441_s0 }
   0xd   :  { %v53_v1 = vmul.f32 %v52_v0, %v52_v0  ;;  %v77_v4 = vmul.f32 %v76_v2, %v76_v2  ;;  %v372_v7 = vmov 0.0   ;;  %vm70_vm8 = vcmask 57344   ;;  %s374_s0 = smov [#allocation12]   ;;  %s228_s28 = sshll.u32 %s445_s4, 4  ;;  %s229_s28 = int_to_ptr.hbm [resolvable:$true] %s228_s28 }
   0xe   :  { %75 = vst.msk [vmem:[#allocation12] sm:$0x1] %vm73_vm1, %v372_v7  ;;  %v373_v30 = vmov -inf   ;;  %vm129_vm9 = vcmask 64512   ;;  %s226_s25 = sshll.u32 %s374_s0, 4  ;;  %s375_s4 = smov [#allocation11]   ;;  %s227_s25 = int_to_ptr.vmem [resolvable:$true] %s226_s25 }
   0xf   :  { %v55_v3 = vsel %vm54_vm0, %v53_v1, 0.0  ;;  %v79_v5 = vsel %vm54_vm0, %v77_v4, 0.0  ;;  %74 = vst.msk [vmem:[#allocation11] sm:$0x1] %vm73_vm1, %v372_v7  ;;  %s215_s29 = sshll.u32 %s375_s4, 4  ;;  %s217_s6 = sshll.u32 %s444_s3, 4  ;;  %s216_s29 = int_to_ptr.vmem [resolvable:$true] %s215_s29  ;;  %s218_s6 = int_to_ptr.hbm [resolvable:$true] %s217_s6 }
  0x10   :  { %56 = vadd.xlane.f32.xlu0 %v55_v3  ;;  %71 = vst.msk [vmem:[#allocation3] sm:$0x1] %vm70_vm8, %v373_v30 }
  0x11   :  { %72 = vst.msk [vmem:[#allocation4] sm:$0x1] %vm70_vm8, %v372_v7 }
  0x15   :  { %v153_v39 = vld [vmem:[#allocation12] sm:$0x1] }
  0x17   :  { %v162_v47 = vld [vmem:[#allocation3] sm:$0x1] }
  0x18   :  { %80 = vadd.xlane.f32.xlu0 %v79_v5  ;;  %v170_v62 = vld [vmem:[#allocation4] sm:$0x1] }
  0x83   :  { %v57_v6 = vpop.xlane.xlu0 %56 }
  0x84   :  { %252 = vrsqrt.f32 %v57_v6  ;;  %vm64_vm3 = vweird.f32 %v57_v6 }
  0x8a   :  { %v253_v8 = vpop.eup %252 }
  0x8b   :  { %v59_v9 = vmul.f32 %v253_v8, %v57_v6  ;;  %v81_v10 = vpop.xlane.xlu0 %80  ;;  %vm65_vm2 = vweird.f32 %v253_v8 }
  0x8c   :  { %254 = vrsqrt.f32 %v81_v10  ;;  %vm66_vm4 = vmor %vm64_vm3, %vm65_vm2  ;;  %vm88_vm6 = vweird.f32 %v81_v10 }
  0x8d   :  { %v60_v11 = vmul.f32 %v253_v8, %v59_v9 }
  0x8f   :  { %v61_v12 = vmul.f32 0.5, %v60_v11 }
  0x91   :  { %v62_v13 = vsub.f32 1.5, %v61_v12 }
  0x92   :  { %v255_v14 = vpop.eup %254 }
  0x93   :  { %v63_v15 = vmul.f32 %v253_v8, %v62_v13  ;;  %v83_v16 = vmul.f32 %v255_v14, %v81_v10  ;;  %vm89_vm5 = vweird.f32 %v255_v14 }
  0x94   :  { %vm90_vm7 = vmor %vm88_vm6, %vm89_vm5 }
  0x95   :  { %v67_v17 = vsel %vm66_vm4, %v253_v8, %v63_v15  ;;  %v84_v18 = vmul.f32 %v255_v14, %v83_v16 }
  0x96   :  { %v68_v19 = vmul.f32 %v67_v17, %v52_v0 }
  0x97   :  { %v85_v20 = vmul.f32 0.5, %v84_v18 }
  0x98   :  { %69 = vst.msk [vmem:[#allocation2] sm:$0xff] %vm54_vm0, %v68_v19 }
  0x99   :  { %v86_v21 = vsub.f32 1.5, %v85_v20 }
  0x9b   :  { %v87_v22 = vmul.f32 %v255_v14, %v86_v21 }
  0x9d   :  { %v91_v24 = vsel %vm90_vm7, %v255_v14, %v87_v22 }
  0x9e   :  { %v93_v25 = vmul.f32 %v92_v23, %v91_v24 }
  0x9f   :  { %v95_v26 = vld [vmem:[#allocation2] sm:$0xff] }
  0xa0   :  { %244 = vmatpush.xpose.msk.msra.mxu0 %vm54_vm0, %v95_v26  ;;  %v94_v27 = vmul.f32 %v93_v25, %v76_v2 }
  0xa2   :  { %v125_v28 = vmul.f32 %v95_v26, %v94_v27 }
  0xa3   :  { %245 = vmatmul.msk.f32.vlgmr.msra.gmra.mxu0 %vm54_vm0, %v94_v27 }
  0xa4   :  { %v126_v29 = vsel %vm54_vm0, %v125_v28, 0.0  ;;  %v142_v28 = vld [vmem:[#allocation11] sm:$0x1] }
  0xa5   :  { %127 = vadd.xlane.f32.xlu2 %v126_v29 }
 0x118   :  { %v420_v31 = vpop.xlane.xlu2 %127 }
 0x119   :  { %v154_v32 = vrot.slane %v420_v31, 4 }
 0x11b   :  { %v155_v33 = vadd.f32 %v154_v32, %v420_v31 }
 0x11d   :  { %v156_v34 = vrot.slane %v155_v33, 2 }
 0x11f   :  { %v157_v35 = vadd.f32 %v156_v34, %v155_v33 }
 0x120   :  { %v119_v36 = vpop.f32.mrf.mxu0 }
 0x121   :  { %v158_v37 = vrot.slane %v157_v35, 1  ;;  %v130_v38 = vsel %vm129_vm9, %v119_v36, -inf }
 0x122   :  { %v163_v40 = vrot.slane %v130_v38, 4  ;;  %131 = vmax.xlane.f32.xlu1 %v130_v38 }
 0x123   :  { %v159_v41 = vadd.f32 %v158_v37, %v157_v35 }
 0x124   :  { %v164_v42 = vmax.f32 %v130_v38, %v163_v40 }
 0x125   :  { %v160_v43 = vsub.f32 %v153_v39, %v159_v41 }
 0x126   :  { %v165_v44 = vrot.slane %v164_v42, 2 }
 0x127   :  { %161 = vst.msk [vmem:[#allocation12] sm:$0x1] %vm73_vm1, %v160_v43 }
 0x128   :  { %v166_v45 = vmax.f32 %v164_v42, %v165_v44 }
 0x12a   :  { %v167_v46 = vrot.slane %v166_v45, 1 }
 0x12c   :  { %v168_v48 = vmax.f32 %v166_v45, %v167_v46 }
 0x12e   :  { %v169_v49 = vmax.f32 %v162_v47, %v168_v48  ;;  %v203_v14 = vld [vmem:[#allocation12] sm:$0x1] }
 0x130   :  { %v176_v50 = vperm.slane %v169_v49, 0  ;;  %191 = vst.msk [vmem:[#allocation3] sm:$0x1] %vm70_vm8, %v169_v49  ;;  %v171_v53 = vsub.f32 %v162_v47, %v169_v49 }
 0x132   :  { %v178_v51 = vsub.f32 %v119_v36, %v176_v50  ;;  %v172_v54 = vmul.f32 1.442695, %v171_v53 }
 0x134   :  { %v179_v52 = vmul.f32 1.442695, %v178_v51 }
 0x136   :  { %256 = vpow2.f32 %v179_v52 }
 0x137   :  { %258 = vpow2.f32 %v172_v54  ;;  %v195_v6 = vld [vmem:[#allocation3] sm:$0x1] }
 0x13c   :  { %v257_v55 = vpop.eup %256 }
 0x13d   :  { %v181_v56 = vsel %vm129_vm9, %v257_v55, 0.0  ;;  %v259_v61 = vpop.eup %258 }
 0x13e   :  { %v182_v57 = vrot.slane %v181_v56, 4  ;;  %v174_v0 = vmul.f32 %v259_v61, %v170_v62 }
 0x140   :  { %v183_v58 = vadd.f32 %v182_v57, %v181_v56 }
 0x142   :  { %v184_v59 = vrot.slane %v183_v58, 2 }
 0x144   :  { %v185_v60 = vadd.f32 %v184_v59, %v183_v58 }
 0x146   :  { %v186_v63 = vrot.slane %v185_v60, 1 }
 0x148   :  { %v187_v1 = vadd.f32 %v186_v63, %v185_v60 }
 0x14a   :  { %v188_v2 = vadd.f32 %v187_v1, %v174_v0 }
 0x14c   :  { %190 = vst.msk [vmem:[#allocation4] sm:$0x1] %vm70_vm8, %v188_v2 }
 0x153   :  { %v196_v3 = vld [vmem:[#allocation4] sm:$0x1] }
 0x154   :  { %260 = vlog2.f32 %v196_v3 }
 0x15a   :  { %v261_v4 = vpop.eup %260 }
 0x15b   :  { %v198_v5 = vmul.f32 0.6931472, %v261_v4 }
 0x15d   :  { %v199_v7 = vadd.f32 %v198_v5, %v195_v6 }
 0x15f   :  { %v204_v8 = vsel %vm70_vm8, %v199_v7, 0.0 }
 0x160   :  { %205 = vadd.xlane.f32.xlu2 %v204_v8 }
 0x195   :  { %v132_v9 = vpop.xlane.xlu1 %131 }
 0x196   :  { %v133_v10 = vsub.f32 %v119_v36, %v132_v9 }
 0x198   :  { %v134_v11 = vmul.f32 1.442695, %v133_v10 }
 0x19a   :  { %262 = vpow2.f32 %v134_v11 }
 0x1a0   :  { %v263_v12 = vpop.eup %262 }
 0x1a1   :  { %v136_v13 = vsel %vm129_vm9, %v263_v12, 0.0 }
 0x1a2   :  { %137 = vadd.xlane.f32.xlu1 %v136_v13 }
 0x1d3   :  { %v206_v15 = vpop.xlane.xlu2 %205 }
 0x1d4   :  { %v207_v16 = vadd.f32 %v206_v15, %v203_v14 }
 0x1d6   :  { %v208_v17 = vmul.f32 0.125, %v207_v16 }
 0x1d8   :  { %209 = vst.msk [vmem:[#allocation12] sm:$0x1] %vm73_vm1, %v208_v17 }
 0x1d9   :  { %231 = dma.vmem_to_hbm [thread:$0]  %s227_s25, 16, %s229_s28, [#allocation13]  }
 0x215   :  { %v138_v18 = vpop.xlane.xlu1 %137 }
 0x216   :  { %264 = vlog2.f32 %v138_v18 }
 0x21c   :  { %v265_v19 = vpop.eup %264 }
 0x21d   :  { %v140_v20 = vmul.f32 0.6931472, %v265_v19 }
 0x21f   :  { %v141_v21 = vadd.f32 %v140_v20, %v132_v9 }
 0x221   :  { %v143_v22 = vsub.f32 %v141_v21, %v420_v31 }
 0x223   :  { %v144_v23 = vrot.slane %v143_v22, 4 }
 0x225   :  { %v145_v24 = vadd.f32 %v144_v23, %v143_v22 }
 0x227   :  { %v146_v25 = vrot.slane %v145_v24, 2 }
 0x229   :  { %v147_v26 = vadd.f32 %v146_v25, %v145_v24 }
 0x22b   :  { %v148_v27 = vrot.slane %v147_v26, 1 }
 0x22d   :  { %v149_v29 = vadd.f32 %v148_v27, %v147_v26 }
 0x22f   :  { %v150_v30 = vadd.f32 %v149_v29, %v142_v28 }
 0x231   :  { %152 = vst.msk [vmem:[#allocation11] sm:$0x1] %vm73_vm1, %v150_v30 }
 0x238   :  { %v200_v32 = vld [vmem:[#allocation11] sm:$0x1] }
 0x239   :  { %v201_v33 = vmul.f32 0.125, %v200_v32 }
 0x23b   :  { %202 = vst.msk [vmem:[#allocation11] sm:$0x1] %vm73_vm1, %v201_v33 }
 0x23c   :  { %220 = dma.vmem_to_hbm [thread:$0]  %s216_s29, 16, %s218_s6, [#allocation8]  }
 0x23d   :  { %366 = dma.done.wait [#allocation8], 16  }
 0x23e   :  { %367 = vsyncadd [#allocation8], 4294967280 }
 0x23f   :  { %368 = dma.done.wait [#allocation13], 16  }
 0x240   :  { %369 = vsyncadd [#allocation13], 4294967280 }
 0x241   :  { %240 = vsyncpa [#allocation7], 1 }
 0x242   :  { %241 = vsyncpa [#allocation10], 1 }
 0x243   :  { %242 = vsyncpa [#allocation8], 1 }
 0x244   :  { %243 = vsyncpa [#allocation13], 1 }

</bundles_post_ra>
